<compile_context>
chip_gen: v7x
topology: tpu7x:2x2x1
jax: 0.10.0
libtpu: 0.0.40
codegen_flags: <defaults>
</compile_context>

<pallas_src>
import jax
import jax.numpy as jnp
from jax import lax
from jax.experimental import pallas as pl
from jax.experimental.pallas import tpu as pltpu


def _round_up(x, m):
    return (x + m - 1) // m * m


def critic_kernel(s_ref, a_ref, w1s_ref, w1a_ref, b1_ref, w2_ref, b2_ref,
                  w3_ref, b3_ref, out_ref):
    """One TM-row batch tile of  q = relu(relu([s||a]@W1+b1)@W2+b2)@W3 + b3.

    s_ref: [TM, in_dim] f32    a_ref: [TM, n_act] f32
    w1s:   [in_dim, fc1] bf16  w1a:   [n_act, fc1] f32   b1: [1, fc1] f32
    w2:    [fc1, fc2]   bf16   b2:    [1, fc2] f32
    w3:    [1, fc2]     bf16   b3:    (1,) f32 (SMEM)
    out:   [1, TM] f32  (lane-packed q row for this batch tile)
    """
    bf16 = jnp.bfloat16

    # ---- Layer 1: state part on the MXU (bf16 operands, f32 accumulate). ----
    h1 = jnp.dot(s_ref[...].astype(bf16), w1s_ref[...],
                 preferred_element_type=jnp.float32)              # [TM, fc1] f32

    # Action part: K = n_actions is tiny -> VPU broadcast FMAs (exact f32)
    # instead of wasting an MXU push/pop + vex slot on a K=2 matmul.
    a = a_ref[...]                                                # [TM, n_act]
    w1a = w1a_ref[...]                                            # [n_act, fc1]
    n_act = a.shape[1]
    if n_act <= 8:
        for k in range(n_act):                                    # static unroll
            h1 = h1 + a[:, k:k + 1] * w1a[k:k + 1, :]
    else:  # fallback for wide action spaces: MXU path
        h1 = h1 + jnp.dot(a.astype(bf16), w1a.astype(bf16),
                          preferred_element_type=jnp.float32)

    # Bias in f32, cast to bf16, ReLU in bf16 (== ReLU-then-cast, fewer vregs).
    h1 = jnp.maximum((h1 + b1_ref[...]).astype(bf16), bf16(0))    # [TM, fc1] bf16

    # ---- Layer 2 (bf16 MXU, f32 accumulate) ----
    h2 = jnp.dot(h1, w2_ref[...], preferred_element_type=jnp.float32) + b2_ref[...]
    h2 = jnp.maximum(h2.astype(bf16), bf16(0))                    # [TM, fc2] bf16

    # ---- Head (out_features=1): contract fc2 against the [1, fc2] w3 row so
    # the MXU result is a lane-dense [1, TM] row (no lane-sparse output). ----
    q_row = lax.dot_general(w3_ref[...], h2,
                            dimension_numbers=(((1,), (1,)), ((), ())),
                            preferred_element_type=jnp.float32)   # [1, TM]
    out_ref[...] = (q_row + b3_ref[0]).astype(out_ref.dtype)


def critic_forward(state, action, params, *, block_b=1024):
    """Fused forward pass of CriticNetwork. Returns q1 of shape [B, 1] (f32)."""
    w1s, w1a, b1, w2, b2, w3, b3 = params
    B, in_dim = state.shape
    n_act = action.shape[1]

    # Balanced batch tiling: near-equal tiles instead of round_up(B, tm)
    # (avoids up-to-2x padding waste on awkward batch sizes).
    ntiles = max(1, -(-B // block_b))                 # ceil(B / block_b)
    # v7x has 2 TensorCores: keep the parallel grid >= 2 when the batch is big
    # enough that two tiles still amortize the ~0.35 us per-step overhead.
    if ntiles == 1 and B >= 512:
        ntiles = 2
    tm = _round_up(-(-B // ntiles), 8)                # round_up(ceil(B/ntiles), 8)
    b_pad = ntiles * tm
    if b_pad != B:
        state = jnp.pad(state, ((0, b_pad - B), (0, 0)))
        action = jnp.pad(action, ((0, b_pad - B), (0, 0)))

    const = lambda i: (0, 0)  # weights/biases: same block every step -> VMEM-resident

    out = pl.pallas_call(
        critic_kernel,
        out_shape=jax.ShapeDtypeStruct((ntiles, tm), jnp.float32),
        grid=(ntiles,),
        in_specs=[
            pl.BlockSpec((tm, in_dim), lambda i: (i, 0)),   # state tile
            pl.BlockSpec((tm, n_act), lambda i: (i, 0)),    # action tile
            pl.BlockSpec(w1s.shape, const),
            pl.BlockSpec(w1a.shape, const),
            pl.BlockSpec(b1.shape, const),
            pl.BlockSpec(w2.shape, const),
            pl.BlockSpec(b2.shape, const),
            pl.BlockSpec(w3.shape, const),
            pl.BlockSpec(memory_space=pltpu.MemorySpace.SMEM),  # b3: (1,) scalar
        ],
        out_specs=pl.BlockSpec((1, tm), lambda i: (i, 0)),  # lane-packed q row
        compiler_params=pltpu.CompilerParams(
            dimension_semantics=("parallel",),
            vmem_limit_bytes=32 * 1024 * 1024,  # headroom vs v5e's 16 MiB default
        ),
    )(state, action, w1s, w1a, b1, w2, b2, w3, b3)

    # Tile i holds rows [i*tm, (i+1)*tm); flatten, drop padded rows.
    return out.reshape(b_pad)[:B].reshape(B, 1)


def init_params(key, input_dim, n_actions, fc1_dims=256, fc2_dims=128):
    """Deterministic init mimicking nn.Linear's U(-1/sqrt(fan_in), 1/sqrt(fan_in))."""
    def linear(k, fan_in, fan_out):
        kw, kb = jax.random.split(k)
        bound = 1.0 / jnp.sqrt(jnp.float32(fan_in))
        w = jax.random.uniform(kw, (fan_in, fan_out), jnp.float32, -bound, bound)
        b = jax.random.uniform(kb, (1, fan_out), jnp.float32, -bound, bound)
        return w, b

    k1, k2, k3 = jax.random.split(key, 3)
    w1, b1 = linear(k1, input_dim + n_actions, fc1_dims)
    w2, b2 = linear(k2, fc1_dims, fc2_dims)
    w3_col, b3 = linear(k3, fc2_dims, 1)              # [fc2, 1], [1, 1]

    # Split w1 so the state||action concat is fused; pre-cast MXU weights to
    # bf16 (activation casts stay in-kernel); VPU/bias params stay f32.
    w1s = w1[:input_dim].astype(jnp.bfloat16)         # [in_dim, fc1]  bf16 (MXU)
    w1a = w1[input_dim:]                              # [n_act, fc1]   f32  (VPU)
    w2 = w2.astype(jnp.bfloat16)                      # [fc1, fc2]     bf16 (MXU)
    w3 = w3_col.T.astype(jnp.bfloat16)                # [1, fc2]       bf16 (MXU head)
    b3 = b3.reshape(1)                                # (1,) scalar for SMEM
    return (w1s, w1a, b1, w2, b2, w3, b3)


def ref_forward(state, action, params):
    """Pure-JAX reference mirroring the kernel's bf16-operand / f32-accum math."""
    w1s, w1a, b1, w2, b2, w3, b3 = params
    bf16 = jnp.bfloat16
    h1 = (jnp.dot(state.astype(bf16), w1s, preferred_element_type=jnp.float32)
          + jnp.dot(action, w1a) + b1)
    h1 = jnp.maximum(h1.astype(bf16), bf16(0))
    h2 = jnp.dot(h1, w2, preferred_element_type=jnp.float32) + b2
    h2 = jnp.maximum(h2.astype(bf16), bf16(0))
    return jnp.dot(h2, w3.T, preferred_element_type=jnp.float32) + b3[0]


def ref_forward_f32(state, action, params):
    """Full-f32 reference (PyTorch semantics) to bound the bf16 drift."""
    w1s, w1a, b1, w2, b2, w3, b3 = params
    w1 = jnp.concatenate([w1s.astype(jnp.float32), w1a], axis=0)
    x = jnp.concatenate([state, action], axis=1)
    h1 = jnp.maximum(x @ w1 + b1, 0.0)
    h2 = jnp.maximum(h1 @ w2.astype(jnp.float32) + b2, 0.0)
    return h2 @ w3.astype(jnp.float32).T + b3[0]


if __name__ == "__main__":
    # Small shapes consistent with the module: input_dims=(8,), n_actions=2, batch=4.
    input_dim, n_actions, batch = 8, 2, 4

    key = jax.random.PRNGKey(0)
    k_params, k_state, k_action = jax.random.split(key, 3)

    params = init_params(k_params, input_dim, n_actions)
    state = jax.random.normal(k_state, (batch, input_dim), jnp.float32)
    action = jax.random.normal(k_action, (batch, n_actions), jnp.float32)

    q1 = critic_forward(state, action, params)
    jax.block_until_ready(q1)
    assert q1.shape == (batch, 1)

    # Exact-math (bf16-mirroring) check.
    ref = ref_forward(state, action, params)
    assert jnp.allclose(q1, ref, atol=1e-2, rtol=1e-2), (
        f"max abs err vs bf16 ref {jnp.max(jnp.abs(q1 - ref))}")
    # Looser check vs the true-f32 PyTorch semantics (bounds bf16 drift).
    ref32 = ref_forward_f32(state, action, params)
    assert jnp.allclose(q1, ref32, atol=5e-2, rtol=5e-2), (
        f"max abs err vs f32 ref {jnp.max(jnp.abs(q1 - ref32))}")

    # TODO(synk): AdamW optimizer and checkpoint save/load are host-side
    # training utilities with no Pallas equivalent; only forward is implemented.
    print("KERNEL_OK")
</pallas_src>

<mosaic_0001>
module attributes {stable_mosaic.version = 11 : i64} {
  func.func @critic_kernel(%arg0: i32, %arg1: memref<8x8xf32, #tpu.memory_space<vmem>>, %arg2: memref<8x2xf32, #tpu.memory_space<vmem>>, %arg3: memref<8x256xbf16, #tpu.memory_space<vmem>>, %arg4: memref<2x256xf32, #tpu.memory_space<vmem>>, %arg5: memref<1x256xf32, #tpu.memory_space<vmem>>, %arg6: memref<256x128xbf16, #tpu.memory_space<vmem>>, %arg7: memref<1x128xf32, #tpu.memory_space<vmem>>, %arg8: memref<1x128xbf16, #tpu.memory_space<vmem>>, %arg9: memref<1xf32, #tpu.memory_space<smem>>, %arg10: memref<1x8xf32, #tpu.memory_space<vmem>>) attributes {dimension_semantics = [#tpu.dimension_semantics<parallel>], iteration_bounds = array<i64: 1>, scalar_prefetch = 0 : i64, scratch_operands = 0 : i64, tpu.core_type = #tpu.core_type<tc>, window_params = [{transform_indices = @transform_0, window_bounds = array<i64: 8, 8>}, {transform_indices = @transform_1, window_bounds = array<i64: 8, 2>}, {pipeline_mode = #tpu.pipeline_mode<synchronous>, transform_indices = @transform_2, window_bounds = array<i64: 8, 256>}, {pipeline_mode = #tpu.pipeline_mode<synchronous>, transform_indices = @transform_3, window_bounds = array<i64: 2, 256>}, {pipeline_mode = #tpu.pipeline_mode<synchronous>, transform_indices = @transform_4, window_bounds = array<i64: 1, 256>}, {pipeline_mode = #tpu.pipeline_mode<synchronous>, transform_indices = @transform_5, window_bounds = array<i64: 256, 128>}, {pipeline_mode = #tpu.pipeline_mode<synchronous>, transform_indices = @transform_6, window_bounds = array<i64: 1, 128>}, {pipeline_mode = #tpu.pipeline_mode<synchronous>, transform_indices = @transform_7, window_bounds = array<i64: 1, 128>}, {transform_indices = @transform_8, window_bounds = array<i64: 1>}, {transform_indices = @transform_9, window_bounds = array<i64: 1, 8>}]} {
    %c0 = arith.constant 0 : index
    %c0_0 = arith.constant 0 : index
    %0 = vector.load %arg1[%c0, %c0_0] : memref<8x8xf32, #tpu.memory_space<vmem>>, vector<8x8xf32>
    %1 = arith.truncf %0 : vector<8x8xf32> to vector<8x8xbf16>
    %c0_1 = arith.constant 0 : index
    %c0_2 = arith.constant 0 : index
    %2 = vector.load %arg3[%c0_1, %c0_2] : memref<8x256xbf16, #tpu.memory_space<vmem>>, vector<8x256xbf16>
    %cst = arith.constant dense<0.000000e+00> : vector<8x256xf32>
    %3 = tpu.matmul %1, %2, %cst {dimension_numbers = #tpu.dot_dimension_numbers<[1], [0], [0], [1], [0, 0, 1, 1], [], []>} : vector<8x8xbf16>, vector<8x256xbf16>, vector<8x256xf32> -> vector<8x256xf32>
    %c0_3 = arith.constant 0 : index
    %c0_4 = arith.constant 0 : index
    %4 = vector.load %arg2[%c0_3, %c0_4] : memref<8x2xf32, #tpu.memory_space<vmem>>, vector<8x2xf32>
    %c0_5 = arith.constant 0 : index
    %c0_6 = arith.constant 0 : index
    %5 = vector.load %arg4[%c0_5, %c0_6] : memref<2x256xf32, #tpu.memory_space<vmem>>, vector<2x256xf32>
    %6 = vector.extract_strided_slice %4 {offsets = [0, 0], sizes = [8, 1], strides = [1, 1]} : vector<8x2xf32> to vector<8x1xf32>
    %7 = vector.extract_strided_slice %5 {offsets = [0, 0], sizes = [1, 256], strides = [1, 1]} : vector<2x256xf32> to vector<1x256xf32>
    %8 = vector.broadcast %6 : vector<8x1xf32> to vector<8x256xf32>
    %9 = vector.broadcast %7 : vector<1x256xf32> to vector<8x256xf32>
    %10 = arith.mulf %8, %9 : vector<8x256xf32>
    %11 = arith.addf %3, %10 : vector<8x256xf32>
    %12 = vector.extract_strided_slice %4 {offsets = [0, 1], sizes = [8, 1], strides = [1, 1]} : vector<8x2xf32> to vector<8x1xf32>
    %13 = vector.extract_strided_slice %5 {offsets = [1, 0], sizes = [1, 256], strides = [1, 1]} : vector<2x256xf32> to vector<1x256xf32>
    %14 = vector.broadcast %12 : vector<8x1xf32> to vector<8x256xf32>
    %15 = vector.broadcast %13 : vector<1x256xf32> to vector<8x256xf32>
    %16 = arith.mulf %14, %15 : vector<8x256xf32>
    %17 = arith.addf %11, %16 : vector<8x256xf32>
    %c0_7 = arith.constant 0 : index
    %c0_8 = arith.constant 0 : index
    %18 = vector.load %arg5[%c0_7, %c0_8] : memref<1x256xf32, #tpu.memory_space<vmem>>, vector<1x256xf32>
    %19 = vector.broadcast %18 : vector<1x256xf32> to vector<8x256xf32>
    %20 = arith.addf %17, %19 : vector<8x256xf32>
    %21 = arith.truncf %20 : vector<8x256xf32> to vector<8x256xbf16>
    %cst_9 = arith.constant 0.000000e+00 : bf16
    %22 = vector.broadcast %cst_9 : bf16 to vector<8x256xbf16>
    %23 = arith.maximumf %21, %22 : vector<8x256xbf16>
    %c0_10 = arith.constant 0 : index
    %c0_11 = arith.constant 0 : index
    %24 = vector.load %arg6[%c0_10, %c0_11] : memref<256x128xbf16, #tpu.memory_space<vmem>>, vector<256x128xbf16>
    %cst_12 = arith.constant dense<0.000000e+00> : vector<8x128xf32>
    %25 = tpu.matmul %23, %24, %cst_12 {dimension_numbers = #tpu.dot_dimension_numbers<[1], [0], [0], [1], [0, 0, 1, 1], [], []>} : vector<8x256xbf16>, vector<256x128xbf16>, vector<8x128xf32> -> vector<8x128xf32>
    %c0_13 = arith.constant 0 : index
    %c0_14 = arith.constant 0 : index
    %26 = vector.load %arg7[%c0_13, %c0_14] : memref<1x128xf32, #tpu.memory_space<vmem>>, vector<1x128xf32>
    %27 = vector.broadcast %26 : vector<1x128xf32> to vector<8x128xf32>
    %28 = arith.addf %25, %27 : vector<8x128xf32>
    %29 = arith.truncf %28 : vector<8x128xf32> to vector<8x128xbf16>
    %cst_15 = arith.constant 0.000000e+00 : bf16
    %30 = vector.broadcast %cst_15 : bf16 to vector<8x128xbf16>
    %31 = arith.maximumf %29, %30 : vector<8x128xbf16>
    %c0_16 = arith.constant 0 : index
    %c0_17 = arith.constant 0 : index
    %32 = vector.load %arg8[%c0_16, %c0_17] : memref<1x128xbf16, #tpu.memory_space<vmem>>, vector<1x128xbf16>
    %cst_18 = arith.constant dense<0.000000e+00> : vector<1x8xf32>
    %33 = tpu.matmul %32, %31, %cst_18 {dimension_numbers = #tpu.dot_dimension_numbers<[1], [1], [0], [0], [0, 0, 1, 0], [], []>} : vector<1x128xbf16>, vector<8x128xbf16>, vector<1x8xf32> -> vector<1x8xf32>
    %c0_19 = arith.constant 0 : index
    %34 = memref.load %arg9[%c0_19] : memref<1xf32, #tpu.memory_space<smem>>
    %35 = vector.broadcast %34 : f32 to vector<1x8xf32>
    %36 = arith.addf %33, %35 : vector<1x8xf32>
    %c0_20 = arith.constant 0 : index
    %c0_21 = arith.constant 0 : index
    %37 = vector.load %arg10[%c0_20, %c0_21] : memref<1x8xf32, #tpu.memory_space<vmem>>, vector<1x8xf32>
    tpu.vector_store %arg10[%c0_20, %c0_21], %36 {strides = array<i32>} : memref<1x8xf32, #tpu.memory_space<vmem>>, vector<1x8xf32>,
    return
  }
  func.func @transform_0(%arg0: i32) -> (i32, i32) {
    %c0_i32 = arith.constant 0 : i32
    %c0_i32_0 = arith.constant 0 : i32
    return %arg0, %c0_i32 : i32, i32
  }
  func.func @transform_1(%arg0: i32) -> (i32, i32) {
    %c0_i32 = arith.constant 0 : i32
    %c0_i32_0 = arith.constant 0 : i32
    return %arg0, %c0_i32 : i32, i32
  }
  func.func @transform_2(%arg0: i32) -> (i32, i32) {
    %c0_i32 = arith.constant 0 : i32
    %c0_i32_0 = arith.constant 0 : i32
    %c0_i32_1 = arith.constant 0 : i32
    return %c0_i32, %c0_i32_0 : i32, i32
  }
  func.func @transform_3(%arg0: i32) -> (i32, i32) {
    %c0_i32 = arith.constant 0 : i32
    %c0_i32_0 = arith.constant 0 : i32
    %c0_i32_1 = arith.constant 0 : i32
    return %c0_i32, %c0_i32_0 : i32, i32
  }
  func.func @transform_4(%arg0: i32) -> (i32, i32) {
    %c0_i32 = arith.constant 0 : i32
    %c0_i32_0 = arith.constant 0 : i32
    %c0_i32_1 = arith.constant 0 : i32
    return %c0_i32, %c0_i32_0 : i32, i32
  }
  func.func @transform_5(%arg0: i32) -> (i32, i32) {
    %c0_i32 = arith.constant 0 : i32
    %c0_i32_0 = arith.constant 0 : i32
    %c0_i32_1 = arith.constant 0 : i32
    return %c0_i32, %c0_i32_0 : i32, i32
  }
  func.func @transform_6(%arg0: i32) -> (i32, i32) {
    %c0_i32 = arith.constant 0 : i32
    %c0_i32_0 = arith.constant 0 : i32
    %c0_i32_1 = arith.constant 0 : i32
    return %c0_i32, %c0_i32_0 : i32, i32
  }
  func.func @transform_7(%arg0: i32) -> (i32, i32) {
    %c0_i32 = arith.constant 0 : i32
    %c0_i32_0 = arith.constant 0 : i32
    %c0_i32_1 = arith.constant 0 : i32
    return %c0_i32, %c0_i32_0 : i32, i32
  }
  func.func @transform_8(%arg0: i32) -> i32 {
    %c0_i32 = arith.constant 0 : i32
    %c0_i32_0 = arith.constant 0 : i32
    return %c0_i32 : i32
  }
  func.func @transform_9(%arg0: i32) -> (i32, i32) {
    %c0_i32 = arith.constant 0 : i32
    %c0_i32_0 = arith.constant 0 : i32
    return %arg0, %c0_i32 : i32, i32
  }
}

</mosaic_0001>

<bundles_post_ra>
// kernel: tpu_custom_call.1
= control target key start
LH: loop header
LB: loop body
LE: loop exit
PB: predicated region body
PF: predicated region fallthrough
CT: control target
= control target key end

     0   :  { %15 = vsyncpa [#allocation4], 0  ;;  %s656_s0 = inlined_call_operand.vmem [shape: f32[8,8], index: 0, kind: input, shape index: {}]   ;;  %s657_s1 = inlined_call_operand.vmem [shape: f32[8,2], index: 1, kind: input, shape index: {}]   ;;  %s658_s2 = inlined_call_operand.vmem [shape: bf16[8,256], index: 2, kind: input, shape index: {}]   ;;  %s659_s3 = inlined_call_operand.vmem [shape: f32[2,256], index: 3, kind: input, shape index: {}]   ;;  %s660_s4 = inlined_call_operand.vmem [shape: f32[1,256], index: 4, kind: input, shape index: {}]   ;;  %s661_s5 = inlined_call_operand.hbm [shape: bf16[256,128], index: 5, kind: input, shape index: {}]   ;;  %s662_s6 = inlined_call_operand.vmem [shape: f32[1,128], index: 6, kind: input, shape index: {}]   ;;  %s663_s7 = inlined_call_operand.vmem [shape: bf16[1,128], index: 7, kind: input, shape index: {}]   ;;  %s664_s8 = inlined_call_operand.<no memory space> [shape: f32[1], index: 8, kind: input, shape index: {}]   ;;  %s665_s9 = inlined_call_operand.hbm [shape: f32[1,8], index: 9, kind: output, shape index: {}]  }
   0x1   :  { %16 = vsyncpa [#allocation5], 0  ;;  %s545_s30 = smov [#allocation3]   ;;  %s497_s13 = scalar_lea.hbm %s661_s5, 2048 }
   0x2   :  { %s32_s10 = sshll.u32 %s545_s30, 4  ;;  %p498_p0 = scmp.ne.s32.totalorder %s661_s5, %s497_s13  ;;  %s33_s10 = int_to_ptr.vmem [resolvable:$true] %s32_s10 }
   0x3   :  { %p501_p1 = scmp.lt.u32.totalorder %s497_s13, %s661_s5 }
   0x5   :  { %p503_p2 = pnand %p501_p1, %p498_p0 }
   0x7   :  { %506 = shalt.err (!%p503_p2)
}
   0x8   :  { %s507_s18 = scalar_lea.vmem %s33_s10, 2048  ;;  %p512_p4 = scmp.lt.s32.totalorder %s33_s10, %s33_s10 }
   0x9   :  { %p508_p3 = scmp.ne.s32.totalorder %s33_s10, %s507_s18  ;;  %p513_p5 = scmp.lt.s32.totalorder %s507_s18, %s507_s18 }
   0xb   :  { %p514_p6 = por %p513_p5, %p512_p4 }
   0xd   :  { %p515_p7 = pnand %p514_p6, %p508_p3 }
   0xf   :  { %518 = shalt.err (!%p515_p7)
}
  0x10   :  { %s546_s19 = smov 64   ;;  %s547_s20 = smov 4  }
  0x11   :  { %38 = dma.hbm_to_vmem [thread:$0]  %s661_s5, 2048, %s33_s10, [#allocation4], %s546_s19, %s546_s19, %s547_s20  }
  0x12   :  { %541 = dma.done.wait [#allocation4], 2048  }
  0x13   :  { %542 = vsyncadd [#allocation4], 4294965248  ;;  %v548_v0 = vmov 0   ;;  %v51_v1 = vld [vmem:[%s658_s2] sm:$0xff]  ;;  %vm89_vm0 = vcmask 1043456   ;;  %v483_v10 = vld [vmem:[#allocation3 + $0x48] sm:$0xff]   ;;  %v60_v25 = vlaneseq }
  0x14   :  { %128 = vmatprep.mubr.bf16.mxu0 %v548_v0  ;;  %477 = vset.pattern.permute.xlu0 %v548_v0  ;;  %v49_v2 = vld [vmem:[%s656_s0] sm:$0xff]  ;;  %v419_v4 = vcombine.high %v51_v1, %v51_v1  ;;  %v418_v5 = vcombine.low %v51_v1, %v51_v1  ;;  %vm85_vm1 = vcmask 64512   ;;  %v484_v11 = vld [vmem:[#allocation3 + $0x8] sm:$0xff]   ;;  %v549_v12 = vmov 1   ;;  %v485_v13 = vld [vmem:[#allocation3 + $0x50] sm:$0xff]   ;;  %s552_s12 = smov [#allocation6]  }
  0x15   :  { %v52_v3 = vld [vmem:[%s657_s1] sm:$0xff]  ;;  %v50_v9 = vpack.c.bf16 %v49_v2, %v49_v2  ;;  %v486_v14 = vld [vmem:[#allocation3 + $0x10] sm:$0xff]   ;;  %v487_v15 = vld [vmem:[#allocation3 + $0x58] sm:$0xff]   ;;  %v61_v26 = vshrl.u32 %v60_v25, 7  ;;  %v550_v63 = vmov 0.0   ;;  %vm551_vm2 = vmmov 0  }
  0x16   :  { %56 = vperm.xlu0 %477, %v52_v3   ;;  %v481_v6 = vld [vmem:[#allocation3 + $0x40] sm:$0xff]   ;;  %420 = vmatprep.subr.msk.bf16.mxu0 %vm89_vm0, %v419_v4  ;;  %v91_v8 = vsel %vm89_vm0, %v418_v5, 0  ;;  %v488_v16 = vld [vmem:[#allocation3 + $0x18] sm:$0xff]   ;;  %v491_v19 = vld [vmem:[#allocation3 + $0x68] sm:$0xff]   ;;  %vm401_vm3 = vcmask 57344  }
  0x17   :  { %v482_v7 = vld [vmem:[#allocation3] sm:$0xff]   ;;  %439 = vmatprep.subr.bf16.mxu1 %v481_v6  ;;  %97 = vmatpush1.bf16.msra.mxu0 %v91_v8  ;;  %v492_v20 = vld [vmem:[#allocation3 + $0x28] sm:$0xff]   ;;  %v493_v21 = vld [vmem:[#allocation3 + $0x70] sm:$0xff]   ;;  %v62_v27 = vsub.s32 0, %v61_v26  ;;  %v143_v28 = vsub.s32 1, %v61_v26  ;;  %v66_v30 = vsub.s32 2, %v61_v26 }
  0x18   :  { %440 = vmatpush3.bf16.msra.mxu1 %v482_v7  ;;  %v489_v17 = vld [vmem:[#allocation3 + $0x60] sm:$0xff]   ;;  %v494_v22 = vld [vmem:[#allocation3 + $0x30] sm:$0xff]   ;;  %v495_v23 = vld [vmem:[#allocation3 + $0x78] sm:$0xff]   ;;  %v147_v31 = vsub.s32 3, %v61_v26  ;;  %463 = vmatprep.subr.bf16.mxu0 %v550_v63 }
  0x19   :  { %441 = vmatprep.subr.bf16.mxu1 %v483_v10  ;;  %v490_v18 = vld [vmem:[#allocation3 + $0x20] sm:$0xff]   ;;  %v496_v24 = vld [vmem:[#allocation3 + $0x38] sm:$0xff]  }
  0x1a   :  { %478 = vset.pattern.permute.xlu0 %v549_v12  ;;  %421 = vmatmul.mubr.msk.bf16.vlgmr.msra.gmra.mrb[0].mxu0 %vm85_vm1, %v50_v9  ;;  %v53_v29 = vld [vmem:[%s659_s3] sm:$0xf] }
  0x1b   :  { %138 = vperm.xlu0 %478, %v52_v3   ;;  %v63_v33 = vrot.slane %v53_v29, %v62_v27  ;;  %v144_v34 = vrot.slane %v53_v29, %v143_v28  ;;  %v67_v35 = vrot.slane %v53_v29, %v66_v30  ;;  %v148_v36 = vrot.slane %v53_v29, %v147_v31  ;;  %v163_v42 = vld [vmem:[%s660_s4] sm:$0x3] }
  0x1c   :  { %442 = vmatpush3.bf16.msra.mxu1 %v484_v11  ;;  %v168_v49 = vrot.slane %v163_v42, %v62_v27  ;;  %v172_v53 = vrot.slane %v163_v42, %v143_v28  ;;  %465 = vmatprep.mubr.msk.bf16.mxu0 %vm551_vm2, %v550_v63  ;;  %v422_v2 = vld [vmem:[%s662_s6] ss:$0 sm:$0xff]  ;;  %v360_v11 = vstv %s664_s8  ;;  %s409_s6 = sshll.u32 %s552_s12, 4  ;;  %s410_s6 = int_to_ptr.vmem [resolvable:$true] %s409_s6 }
  0x1d   :  { %443 = vmatprep.subr.bf16.mxu1 %v485_v13  ;;  %v73_v37 = vrot.slane %v63_v33, %v62_v27  ;;  %v154_v38 = vrot.slane %v144_v34, %v143_v28  ;;  %v77_v39 = vrot.slane %v67_v35, %v62_v27  ;;  %v158_v40 = vrot.slane %v148_v36, %v143_v28  ;;  %v358_v10 = vld [vmem:[%s663_s7] sm:$0x1]  ;;  %s519_s13 = scalar_lea.vmem %s410_s6, 16  ;;  %s523_s14 = scalar_lea.vmem %s410_s6, 32 }
  0x1e   :  { %p520_p8 = scmp.ne.s32.totalorder %s410_s6, %s519_s13  ;;  %p524_p9 = scmp.lt.s32.totalorder %s410_s6, %s410_s6 }
  0x1f   :  { %p525_p10 = scmp.lt.s32.totalorder %s523_s14, %s519_s13 }
  0x20   :  { %444 = vmatpush3.bf16.msra.mxu1 %v486_v14 }
  0x21   :  { %445 = vmatprep.subr.bf16.mxu1 %v487_v15  ;;  %p526_p11 = por %p525_p10, %p524_p9 }
  0x23   :  { %p527_p12 = pnand %p526_p11, %p520_p8 }
  0x24   :  { %446 = vmatpush3.bf16.msra.mxu1 %v488_v16 }
  0x25   :  { %447 = vmatprep.subr.bf16.mxu1 %v489_v17 }
  0x28   :  { %448 = vmatpush3.bf16.msra.mxu1 %v490_v18 }
  0x29   :  { %449 = vmatprep.subr.bf16.mxu1 %v491_v19 }
  0x2c   :  { %450 = vmatpush3.bf16.msra.mxu1 %v492_v20 }
  0x2d   :  { %451 = vmatprep.subr.bf16.mxu1 %v493_v21 }
  0x30   :  { %452 = vmatpush3.bf16.msra.mxu1 %v494_v22 }
  0x31   :  { %453 = vmatprep.subr.bf16.mxu1 %v495_v23 }
  0x34   :  { %454 = vmatpush3.bf16.msra.mxu1 %v496_v24 }
  0x95   :  { %v57_v32 = vpop.permute.xlu0 %56 }
  0x96   :  { %v78_v43 = vmul.f32 %v73_v37, %v57_v32  ;;  %v79_v45 = vmul.f32 %v77_v39, %v57_v32 }
  0x9a   :  { %v139_v41 = vpop.permute.xlu0 %138 }
  0x9b   :  { %v159_v44 = vmul.f32 %v154_v38, %v139_v41  ;;  %v160_v46 = vmul.f32 %v158_v40, %v139_v41 }
  0xed   :  { %v130_v47 = vpop.f32.mrb[0].mxu0 }
  0xee   :  { %v131_v48 = vadd.f32 %v130_v47, %v78_v43  ;;  %v132_v50 = vpop.f32.mrb[1].mxu0 }
  0xef   :  { %v133_v51 = vadd.f32 %v132_v50, %v79_v45  ;;  %v134_v52 = vpop.f32.mrb[2].mxu0 }
  0xf0   :  { %v161_v54 = vadd.f32 %v159_v44, %v131_v48  ;;  %v135_v55 = vpop.f32.mrb[3].mxu0 }
  0xf1   :  { %v162_v56 = vadd.f32 %v160_v46, %v133_v51 }
  0xf2   :  { %v175_v57 = vadd.f32 %v168_v49, %v161_v54 }
  0xf3   :  { %v176_v58 = vadd.f32 %v172_v53, %v162_v56 }
  0xf4   :  { %v177_v59 = vpack.c.bf16 %v175_v57, %v175_v57 }
  0xf5   :  { %v178_v60 = vpack.c.bf16 %v176_v58, %v176_v58 }
  0xf6   :  { %v179_v62 = vmax.bf16 %v548_v0, %v177_v59 }
  0xf7   :  { %v180_v61 = vmax.bf16 %v548_v0, %v178_v60 }
  0xf9   :  { %348 = vmatprep.mubr.bf16.mxu1 %v180_v61 }
  0xfa   :  { %349 = vmatmul.mubr.bf16.vlgmr.msra.gmra.mrb[0].mxu1 %v179_v62 }
 0x1cd   :  { %v455_v1 = vpop.f32.mrb[0].mxu1 }
 0x1ce   :  { %v456_v3 = vpop.f32.mrb[1].mxu1 }
 0x1cf   :  { %v457_v4 = vadd.f32 %v456_v3, %v455_v1  ;;  %v458_v5 = vpop.f32.mrb[2].mxu1 }
 0x1d0   :  { %v459_v6 = vpop.f32.mrb[3].mxu1 }
 0x1d1   :  { %v351_v7 = vadd.f32 %v457_v4, %v422_v2 }
 0x1d3   :  { %v356_v8 = vpack.c.bf16 %v351_v7, %v351_v7 }
 0x1d5   :  { %v357_v9 = vmax.bf16 %v548_v0, %v356_v8 }
 0x1d7   :  { %464 = vmatpush3.bf16.xpose.msra.mxu0 %v357_v9 }
 0x1de   :  { %466 = vmatmul.mubr.bf16.vlgmr.msra.gmra.mrb[4].mxu0 %v358_v10 }
 0x2b1   :  { %v395_v12 = vpop.f32.mrb[4].mxu0 }
 0x2b2   :  { %v396_v13 = vadd.f32 %v395_v12, %v360_v11  ;;  %v467_v14 = vpop.f32.mrb[5].mxu0 }
 0x2b3   :  { %v398_v15 = vpop.f32.mrb[6].mxu0 }
 0x2b4   :  { %v468_v16 = vpop.f32.mrb[7].mxu0  ;;  %402 = vst.msk [vmem:[#allocation6] sm:$0x1] %vm401_vm3, %v396_v13 }
 0x2b5   :  { %530 = shalt.err (!%p527_p12)
}
 0x2b6   :  { %s531_s15 = scalar_lea.hbm %s665_s9, 16 }
 0x2b7   :  { %p532_p13 = scmp.ne.s32.totalorder %s665_s9, %s531_s15  ;;  %p535_p0 = scmp.lt.u32.totalorder %s531_s15, %s665_s9 }
 0x2b9   :  { %p537_p1 = pnand %p535_p0, %p532_p13 }
 0x2bb   :  { %540 = shalt.err (!%p537_p1)
}
 0x2bc   :  { %412 = dma.vmem_to_hbm [thread:$0]  %s410_s6, 16, %s665_s9, [#allocation5]  }
 0x2bd   :  { %543 = dma.done.wait [#allocation5], 16  }
 0x2be   :  { %544 = vsyncadd [#allocation5], 4294967280 }
 0x2bf   :  { %416 = vsyncpa [#allocation4], 1 }
 0x2c0   :  { %417 = vsyncpa [#allocation5], 1 }

</bundles_post_ra>
